<compile_context>
chip_gen: v6e
topology: v6e:2x2x1
jax: 0.10.0
libtpu: 0.0.40
codegen_flags: <defaults>
</compile_context>

<pallas_src>
import functools

import jax
import jax.numpy as jnp
import numpy as np
from jax.experimental import pallas as pl
from jax.experimental.pallas import tpu as pltpu

_VMEM_LIMIT = 64 * 1024 * 1024
_NEG_BIG = -1e30  # finite "minus infinity" -> no NaN for fully masked rows


# ---------------------------------------------------------------------------
# Kernel 1: Linear projection  y = x @ W + b   (W pre-transposed to (K, N))
# ---------------------------------------------------------------------------
def _linear_kernel(x_ref, w_ref, b_ref, o_ref):
    o_ref[...] = (
        jnp.dot(x_ref[...], w_ref[...], preferred_element_type=jnp.float32)
        + b_ref[...]
    )


def linear(x2d, wT, b, *, block_m=512):
    M, K = x2d.shape
    N = wT.shape[1]
    bm = min(block_m, M)
    return pl.pallas_call(
        _linear_kernel,
        grid=(pl.cdiv(M, bm),),
        in_specs=[
            pl.BlockSpec((bm, K), lambda i: (i, 0)),
            pl.BlockSpec((K, N), lambda i: (0, 0)),
            pl.BlockSpec((1, N), lambda i: (0, 0)),
        ],
        out_specs=pl.BlockSpec((bm, N), lambda i: (i, 0)),
        out_shape=jax.ShapeDtypeStruct((M, N), jnp.float32),
        compiler_params=pltpu.CompilerParams(
            dimension_semantics=("parallel",),
            vmem_limit_bytes=_VMEM_LIMIT,
        ),
    )(x2d, wT, b.reshape(1, N))


# ---------------------------------------------------------------------------
# Kernel 2: Scaled dot-product attention, all heads of one batch per step.
#   q/k/v blocks arrive in the flat projection layout (len, n_head*d).
# ---------------------------------------------------------------------------
def _attn_kernel(q_ref, k_ref, v_ref, mask_ref, ctx_ref, attn_ref,
                 *, n_head, d_k, d_v, inv_temp):
    masked = mask_ref[0] != 0                       # (len_q, len_k)
    for h in range(n_head):                         # static unroll over heads
        qh = q_ref[0, :, h * d_k:(h + 1) * d_k] * inv_temp   # fold 1/temp into Q
        kh = k_ref[0, :, h * d_k:(h + 1) * d_k]
        vh = v_ref[0, :, h * d_v:(h + 1) * d_v]

        # scores = (q/temp) @ k^T  -- contraction expressed via dot_general,
        # no in-kernel transpose of k.
        s = jax.lax.dot_general(
            qh, kh, (((1,), (1,)), ((), ())),
            preferred_element_type=jnp.float32)
        s = jnp.where(masked, _NEG_BIG, s)

        # softmax over the key axis (torch Softmax(dim=2))
        s_max = jnp.max(s, axis=-1, keepdims=True)
        e = jnp.exp(s - s_max)
        denom = jnp.sum(e, axis=-1, keepdims=True)
        p = e * pl.reciprocal(denom, approx=True)

        attn_ref[h, 0] = p
        ctx_ref[0, :, h * d_v:(h + 1) * d_v] = jnp.dot(
            p, vh, preferred_element_type=jnp.float32)


def fused_attention(qp, kp, vp, mask_i32, *, n_head, d_k, d_v, inv_temp):
    sz_b, len_q, _ = qp.shape
    _, len_k, _ = kp.shape
    _, len_v, _ = vp.shape

    kernel = functools.partial(
        _attn_kernel, n_head=n_head, d_k=d_k, d_v=d_v, inv_temp=inv_temp)

    ctx, attn4 = pl.pallas_call(
        kernel,
        grid=(sz_b,),
        in_specs=[
            pl.BlockSpec((1, len_q, n_head * d_k), lambda b: (b, 0, 0)),
            pl.BlockSpec((1, len_k, n_head * d_k), lambda b: (b, 0, 0)),
            pl.BlockSpec((1, len_v, n_head * d_v), lambda b: (b, 0, 0)),
            pl.BlockSpec((1, len_q, len_k), lambda b: (b, 0, 0)),
        ],
        out_specs=[
            # lane-dense context slab for all heads of this batch
            pl.BlockSpec((1, len_q, n_head * d_v), lambda b: (b, 0, 0)),
            # attention probs, head-major so the wrapper reshape is free
            pl.BlockSpec((n_head, 1, len_q, len_k), lambda b: (0, b, 0, 0)),
        ],
        out_shape=[
            jax.ShapeDtypeStruct((sz_b, len_q, n_head * d_v), jnp.float32),
            jax.ShapeDtypeStruct((n_head, sz_b, len_q, len_k), jnp.float32),
        ],
        compiler_params=pltpu.CompilerParams(
            dimension_semantics=("parallel",),
            vmem_limit_bytes=_VMEM_LIMIT,
        ),
    )(qp, kp, vp, mask_i32)
    return ctx, attn4


# ---------------------------------------------------------------------------
# Kernel 3: output projection + residual add + LayerNorm (fused, row-tiled)
# ---------------------------------------------------------------------------
def _fc_res_ln_kernel(x_ref, w_ref, b_ref, res_ref, g_ref, beta_ref, o_ref, *, eps):
    y = (
        jnp.dot(x_ref[...], w_ref[...], preferred_element_type=jnp.float32)
        + b_ref[...]
        + res_ref[...]
    )
    mean = jnp.mean(y, axis=-1, keepdims=True)
    var = jnp.mean(jnp.square(y - mean), axis=-1, keepdims=True)
    o_ref[...] = (y - mean) * jax.lax.rsqrt(var + eps) * g_ref[...] + beta_ref[...]


def fc_residual_layernorm(x2d, wT, b, res2d, gamma, beta, *, eps=1e-5, block_m=512):
    M, K = x2d.shape
    N = wT.shape[1]
    bm = min(block_m, M)
    kernel = functools.partial(_fc_res_ln_kernel, eps=eps)
    return pl.pallas_call(
        kernel,
        grid=(pl.cdiv(M, bm),),
        in_specs=[
            pl.BlockSpec((bm, K), lambda i: (i, 0)),
            pl.BlockSpec((K, N), lambda i: (0, 0)),
            pl.BlockSpec((1, N), lambda i: (0, 0)),
            pl.BlockSpec((bm, N), lambda i: (i, 0)),
            pl.BlockSpec((1, N), lambda i: (0, 0)),
            pl.BlockSpec((1, N), lambda i: (0, 0)),
        ],
        out_specs=pl.BlockSpec((bm, N), lambda i: (i, 0)),
        out_shape=jax.ShapeDtypeStruct((M, N), jnp.float32),
        compiler_params=pltpu.CompilerParams(
            dimension_semantics=("parallel",),
            vmem_limit_bytes=_VMEM_LIMIT,
        ),
    )(x2d, wT, b.reshape(1, N), res2d, gamma.reshape(1, N), beta.reshape(1, N))


# ---------------------------------------------------------------------------
# Full MultiHeadAttention forward (glue in plain JAX, hot paths in Pallas)
# ---------------------------------------------------------------------------
def multi_head_attention(kparams, q, k, v, mask, *, n_head, d_k, d_v):
    """kparams: output of prepare_kernel_params (weights pre-transposed)."""
    sz_b, len_q, d_model = q.shape
    _, len_k, _ = k.shape
    _, len_v, _ = v.shape
    residual = q

    # Q/K/V projections, kept in the flat (sz_b*len, n_head*d) layout.
    qp = linear(q.reshape(-1, d_model), kparams["w_qs_wT"], kparams["w_qs_b"])
    kp = linear(k.reshape(-1, d_model), kparams["w_ks_wT"], kparams["w_ks_b"])
    vp = linear(v.reshape(-1, d_model), kparams["w_vs_wT"], kparams["w_vs_b"])

    qp = qp.reshape(sz_b, len_q, n_head * d_k)
    kp = kp.reshape(sz_b, len_k, n_head * d_k)
    vp = vp.reshape(sz_b, len_v, n_head * d_v)

    # Mask is indexed per batch inside the kernel — no n_head tiling.
    mask_i32 = mask.astype(jnp.int32)  # (sz_b, len_q, len_k); nonzero == masked

    inv_temp = float(1.0 / np.sqrt(d_k))
    ctx, attn4 = fused_attention(qp, kp, vp, mask_i32,
                                 n_head=n_head, d_k=d_k, d_v=d_v,
                                 inv_temp=inv_temp)

    # ctx already is (sz_b, len_q, n_head*d_v) — the fc input layout.
    out = fc_residual_layernorm(
        ctx.reshape(sz_b * len_q, n_head * d_v),
        kparams["fc_wT"], kparams["fc_b"],
        residual.reshape(sz_b * len_q, d_model),
        kparams["ln_g"], kparams["ln_b"],
    ).reshape(sz_b, len_q, d_model)

    # (n_head, sz_b, len_q, len_k) -> (n_head*sz_b, len_q, len_k): free reshape,
    # same ordering as torch's mask.repeat / view(-1, ...) (index = h*sz_b + b).
    attn = attn4.reshape(n_head * sz_b, len_q, len_k)
    return out, attn


# ---------------------------------------------------------------------------
# Parameter init (mirrors the module __init__ shapes / stats, torch layout)
# and one-time host-side weight transpose for the kernels.
# ---------------------------------------------------------------------------
def init_params(key, n_head, d_model, d_k, d_v):
    ks = jax.random.split(key, 9)
    std_qk = np.sqrt(2.0 / (d_model + d_k))
    std_v = np.sqrt(2.0 / (d_model + d_v))
    std_fc = np.sqrt(2.0 / (n_head * d_v + d_model))  # xavier_normal
    bnd = 1.0 / np.sqrt(d_model)
    bnd_fc = 1.0 / np.sqrt(n_head * d_v)
    return {
        "w_qs_w": std_qk * jax.random.normal(ks[0], (n_head * d_k, d_model), jnp.float32),
        "w_qs_b": jax.random.uniform(ks[1], (n_head * d_k,), jnp.float32, -bnd, bnd),
        "w_ks_w": std_qk * jax.random.normal(ks[2], (n_head * d_k, d_model), jnp.float32),
        "w_ks_b": jax.random.uniform(ks[3], (n_head * d_k,), jnp.float32, -bnd, bnd),
        "w_vs_w": std_v * jax.random.normal(ks[4], (n_head * d_v, d_model), jnp.float32),
        "w_vs_b": jax.random.uniform(ks[5], (n_head * d_v,), jnp.float32, -bnd, bnd),
        "fc_w": std_fc * jax.random.normal(ks[6], (d_model, n_head * d_v), jnp.float32),
        "fc_b": jax.random.uniform(ks[7], (d_model,), jnp.float32, -bnd_fc, bnd_fc),
        "ln_g": jnp.ones((d_model,), jnp.float32),
        "ln_b": jnp.zeros((d_model,), jnp.float32),
    }


def prepare_kernel_params(params):
    """Pre-transpose Linear weights (torch (out,in) -> (in,out)) once on host."""
    kp = dict(params)
    kp["w_qs_wT"] = params["w_qs_w"].T
    kp["w_ks_wT"] = params["w_ks_w"].T
    kp["w_vs_wT"] = params["w_vs_w"].T
    kp["fc_wT"] = params["fc_w"].T
    return kp


# ---------------------------------------------------------------------------
# Pure-JAX reference (sanity check; uses the original torch-layout weights)
# ---------------------------------------------------------------------------
def reference_forward(params, q, k, v, mask, *, n_head, d_k, d_v):
    sz_b, len_q, d_model = q.shape
    _, len_k, _ = k.shape
    residual = q
    qp = q @ params["w_qs_w"].T + params["w_qs_b"]
    kp = k @ params["w_ks_w"].T + params["w_ks_b"]
    vp = v @ params["w_vs_w"].T + params["w_vs_b"]
    qp = qp.reshape(sz_b, len_q, n_head, d_k).transpose(2, 0, 1, 3).reshape(-1, len_q, d_k)
    kp = kp.reshape(sz_b, len_k, n_head, d_k).transpose(2, 0, 1, 3).reshape(-1, len_k, d_k)
    vp = vp.reshape(sz_b, len_k, n_head, d_v).transpose(2, 0, 1, 3).reshape(-1, len_k, d_v)
    m = jnp.tile(mask, (n_head, 1, 1))
    s = jnp.einsum("bqd,bkd->bqk", qp, kp) / np.power(d_k, 0.5)
    s = jnp.where(m, _NEG_BIG, s)
    attn = jax.nn.softmax(s, axis=2)
    ctx = jnp.einsum("bqk,bkd->bqd", attn, vp)
    ctx = ctx.reshape(n_head, sz_b, len_q, d_v).transpose(1, 2, 0, 3).reshape(sz_b, len_q, -1)
    out = ctx @ params["fc_w"].T + params["fc_b"] + residual
    mu = out.mean(-1, keepdims=True)
    var = ((out - mu) ** 2).mean(-1, keepdims=True)
    out = (out - mu) / jnp.sqrt(var + 1e-5) * params["ln_g"] + params["ln_b"]
    return out, attn


if __name__ == "__main__":
    n_head, d_model, d_k, d_v = 4, 32, 8, 8
    sz_b, seq = 2, 8

    key = jax.random.PRNGKey(0)
    kp_, kq, kk, kv = jax.random.split(key, 4)
    params = init_params(kp_, n_head, d_model, d_k, d_v)
    kparams = prepare_kernel_params(params)

    q = jax.random.normal(kq, (sz_b, seq, d_model), jnp.float32)
    k = jax.random.normal(kk, (sz_b, seq, d_model), jnp.float32)
    v = jax.random.normal(kv, (sz_b, seq, d_model), jnp.float32)

    # Padding-style mask of shape (sz_b, len_q, len_k): batch 0 sees all keys,
    # batch 1 masks its last 2 keys (True == masked out).
    valid = jnp.array([seq, seq - 2])
    key_mask = jnp.arange(seq)[None, :] >= valid[:, None]              # (sz_b, len_k)
    mask = jnp.broadcast_to(key_mask[:, None, :], (sz_b, seq, seq))    # (sz_b, len_q, len_k)

    out, attn = multi_head_attention(kparams, q, k, v, mask,
                                     n_head=n_head, d_k=d_k, d_v=d_v)
    out = jax.block_until_ready(out)
    attn = jax.block_until_ready(attn)

    out_ref, attn_ref = reference_forward(params, q, k, v, mask,
                                          n_head=n_head, d_k=d_k, d_v=d_v)

    assert out.shape == (sz_b, seq, d_model)
    assert attn.shape == (n_head * sz_b, seq, seq)
    np.testing.assert_allclose(np.asarray(attn), np.asarray(attn_ref), atol=2e-2, rtol=2e-2)
    np.testing.assert_allclose(np.asarray(out), np.asarray(out_ref), atol=2e-2, rtol=2e-2)

    print("KERNEL_OK")
</pallas_src>

<mosaic_0001>
module attributes {stable_mosaic.version = 11 : i64} {
  func.func @_linear_kernel(%arg0: i32, %arg1: memref<16x32xf32, #tpu.memory_space<vmem>>, %arg2: memref<32x32xf32, #tpu.memory_space<vmem>>, %arg3: memref<1x32xf32, #tpu.memory_space<vmem>>, %arg4: memref<16x32xf32, #tpu.memory_space<vmem>>) attributes {dimension_semantics = [#tpu.dimension_semantics<parallel>], iteration_bounds = array<i64: 1>, scalar_prefetch = 0 : i64, scratch_operands = 0 : i64, tpu.core_type = #tpu.core_type<tc>, window_params = [{transform_indices = @transform_0, window_bounds = array<i64: 16, 32>}, {pipeline_mode = #tpu.pipeline_mode<synchronous>, transform_indices = @transform_1, window_bounds = array<i64: 32, 32>}, {pipeline_mode = #tpu.pipeline_mode<synchronous>, transform_indices = @transform_2, window_bounds = array<i64: 1, 32>}, {transform_indices = @transform_3, window_bounds = array<i64: 16, 32>}]} {
    %c0 = arith.constant 0 : index
    %c0_0 = arith.constant 0 : index
    %0 = vector.load %arg1[%c0, %c0_0] : memref<16x32xf32, #tpu.memory_space<vmem>>, vector<16x32xf32>
    %c0_1 = arith.constant 0 : index
    %c0_2 = arith.constant 0 : index
    %1 = vector.load %arg2[%c0_1, %c0_2] : memref<32x32xf32, #tpu.memory_space<vmem>>, vector<32x32xf32>
    %cst = arith.constant dense<0.000000e+00> : vector<16x32xf32>
    %2 = tpu.matmul %0, %1, %cst {dimension_numbers = #tpu.dot_dimension_numbers<[1], [0], [0], [1], [0, 0, 1, 1], [], []>} : vector<16x32xf32>, vector<32x32xf32>, vector<16x32xf32> -> vector<16x32xf32>
    %c0_3 = arith.constant 0 : index
    %c0_4 = arith.constant 0 : index
    %3 = vector.load %arg3[%c0_3, %c0_4] : memref<1x32xf32, #tpu.memory_space<vmem>>, vector<1x32xf32>
    %4 = vector.broadcast %3 : vector<1x32xf32> to vector<16x32xf32>
    %5 = arith.addf %2, %4 : vector<16x32xf32>
    %c0_5 = arith.constant 0 : index
    %c0_6 = arith.constant 0 : index
    %6 = vector.load %arg4[%c0_5, %c0_6] : memref<16x32xf32, #tpu.memory_space<vmem>>, vector<16x32xf32>
    tpu.vector_store %arg4[%c0_5, %c0_6], %5 {strides = array<i32>} : memref<16x32xf32, #tpu.memory_space<vmem>>, vector<16x32xf32>,
    return
  }
  func.func @transform_0(%arg0: i32) -> (i32, i32) {
    %c0_i32 = arith.constant 0 : i32
    %c0_i32_0 = arith.constant 0 : i32
    return %arg0, %c0_i32 : i32, i32
  }
  func.func @transform_1(%arg0: i32) -> (i32, i32) {
    %c0_i32 = arith.constant 0 : i32
    %c0_i32_0 = arith.constant 0 : i32
    %c0_i32_1 = arith.constant 0 : i32
    return %c0_i32, %c0_i32_0 : i32, i32
  }
  func.func @transform_2(%arg0: i32) -> (i32, i32) {
    %c0_i32 = arith.constant 0 : i32
    %c0_i32_0 = arith.constant 0 : i32
    %c0_i32_1 = arith.constant 0 : i32
    return %c0_i32, %c0_i32_0 : i32, i32
  }
  func.func @transform_3(%arg0: i32) -> (i32, i32) {
    %c0_i32 = arith.constant 0 : i32
    %c0_i32_0 = arith.constant 0 : i32
    return %arg0, %c0_i32 : i32, i32
  }
}

</mosaic_0001>

<bundles_post_ra>
// kernel: tpu_custom_call.1
= control target key start
LH: loop header
LB: loop body
LE: loop exit
PB: predicated region body
PF: predicated region fallthrough
CT: control target
= control target key end

     0   :  { %8 = vsyncpa [#allocation3], 0  ;;  %s299_s0 = inlined_call_operand.hbm [shape: f32[16,32], index: 0, kind: input, shape index: {}]   ;;  %s300_s1 = inlined_call_operand.hbm [shape: f32[32,32], index: 1, kind: input, shape index: {}]   ;;  %s301_s2 = inlined_call_operand.vmem [shape: f32[1,32], index: 2, kind: input, shape index: {}]   ;;  %s302_s3 = inlined_call_operand.hbm [shape: f32[16,32], index: 3, kind: output, shape index: {}]  }
   0x1   :  { %9 = vsyncpa [#allocation6], 0 }
   0x2   :  { %10 = vsyncpa [#allocation4], 0  ;;  %s249_s12 = smov [#allocation2]  }
   0x3   :  { %s16_s13 = sshll.u32 %s249_s12, 4  ;;  %s17_s13 = int_to_ptr.vmem [resolvable:$true] %s16_s13 }
   0x4   :  { %s191_s14 = scalar_lea.vmem %s17_s13, 256  ;;  %p196_p1 = scmp.lt.s32.totalorder %s17_s13, %s17_s13 }
   0x5   :  { %p192_p0 = scmp.ne.s32.totalorder %s17_s13, %s191_s14  ;;  %p197_p2 = scmp.lt.s32.totalorder %s191_s14, %s191_s14 }
   0x7   :  { %p198_p3 = por %p197_p2, %p196_p1 }
   0x9   :  { %p199_p4 = pnand %p198_p3, %p192_p0 }
   0xb   :  { %202 = shalt.err (!%p199_p4)
}
   0xc   :  { %s250_s15 = smov 128   ;;  %s251_s16 = smov 8  }
   0xd   :  { %22 = dma.hbm_to_vmem [thread:$0]  %s299_s0, 256, %s17_s13, [#allocation3], %s250_s15, %s250_s15, %s251_s16  }
   0xe   :  { %s252_s19 = smov [#allocation5]  }
   0xf   :  { %s28_s20 = sshll.u32 %s252_s19, 4  ;;  %s29_s20 = int_to_ptr.vmem [resolvable:$true] %s28_s20 }
  0x10   :  { %s211_s21 = scalar_lea.vmem %s29_s20, 512  ;;  %p216_p6 = scmp.lt.s32.totalorder %s29_s20, %s29_s20 }
  0x11   :  { %p212_p5 = scmp.ne.s32.totalorder %s29_s20, %s211_s21  ;;  %p217_p7 = scmp.lt.s32.totalorder %s211_s21, %s211_s21 }
  0x13   :  { %p218_p8 = por %p217_p7, %p216_p6 }
  0x15   :  { %p219_p9 = pnand %p218_p8, %p212_p5 }
  0x17   :  { %222 = shalt.err (!%p219_p9)
}
  0x18   :  { %34 = dma.hbm_to_vmem [thread:$0]  %s300_s1, 512, %s29_s20, [#allocation6], %s250_s15, %s250_s15, %s251_s16  }
  0x19   :  { %243 = dma.done.wait [#allocation3], 256  }
  0x1a   :  { %244 = vsyncadd [#allocation3], 4294967040 }
  0x1b   :  { %245 = dma.done.wait [#allocation6], 512  }
  0x1c   :  { %246 = vsyncadd [#allocation6], 4294966784  ;;  %vm56_vm0 = vcmask 261120   ;;  %v48_v0 = vld [vmem:[#allocation5 + $0x18] sm:$0xff]  ;;  %v47_v1 = vld [vmem:[#allocation5 + $0x10] sm:$0xff]  ;;  %s253_s24 = smov [#allocation7]  }
  0x1d   :  { %167 = vmatprep.subr.mxu0 %v48_v0  ;;  %v43_v2 = vld [vmem:[#allocation2] sm:$0xff]  ;;  %v46_v3 = vld [vmem:[#allocation5 + $0x8] sm:$0xff]  ;;  %v45_v4 = vld [vmem:[#allocation5] sm:$0xff]  ;;  %s145_s25 = sshll.u32 %s253_s24, 4  ;;  %s146_s25 = int_to_ptr.vmem [resolvable:$true] %s145_s25 }
  0x1e   :  { %168 = vmatpush3.msra.mxu0 %v48_v0  ;;  %175 = vmatprep.mubr.msk.f32.mxu0 %vm56_vm0, %v43_v2  ;;  %v44_v5 = vld [vmem:[#allocation2 + $0x8] sm:$0xff]  ;;  %v158_v6 = vld [vmem:[%s301_s2] ss:$0 sm:$0xff]  ;;  %s223_s26 = scalar_lea.vmem %s146_s25, 256  ;;  %p228_p11 = scmp.lt.s32.totalorder %s146_s25, %s146_s25 }
  0x1f   :  { %169 = vmatprep.subr.mxu0 %v47_v1  ;;  %p224_p10 = scmp.ne.s32.totalorder %s146_s25, %s223_s26  ;;  %p229_p12 = scmp.lt.s32.totalorder %s223_s26, %s223_s26 }
  0x20   :  { %170 = vmatpush3.msra.mxu0 %v47_v1 }
  0x21   :  { %171 = vmatprep.subr.mxu0 %v46_v3  ;;  %p230_p13 = por %p229_p12, %p228_p11 }
  0x22   :  { %172 = vmatpush3.msra.mxu0 %v46_v3 }
  0x23   :  { %173 = vmatprep.subr.mxu0 %v45_v4  ;;  %p231_p0 = pnand %p230_p13, %p224_p10 }
  0x24   :  { %174 = vmatpush3.msra.mxu0 %v45_v4 }
  0x25   :  { %176 = vmatmul.mubr.msk.f32.vlgmr.msra.gmra.mxu0 %vm56_vm0, %v44_v5 }
  0xe5   :  { %v177_v7 = vpop.f32.mrf.mxu0 }
  0xe6   :  { %v135_v8 = vadd.f32 %v177_v7, %v158_v6 }
  0xe7   :  { %v129_v9 = vpop.f32.mrf.mxu0 }
  0xe8   :  { %139 = vst.msk [vmem:[#allocation7 + $0x8] sm:$0xff] %vm56_vm0, %v135_v8  ;;  %v130_v10 = vadd.f32 %v158_v6, %v129_v9 }
  0xea   :  { %138 = vst.msk [vmem:[#allocation7] sm:$0xff] %vm56_vm0, %v130_v10 }
  0xeb   :  { %234 = shalt.err (!%p231_p0)
}
  0xec   :  { %151 = dma.vmem_to_hbm [thread:$0]  %s146_s25, 256, %s302_s3, [#allocation4], %s250_s15, %s250_s15, %s251_s16  }
  0xed   :  { %247 = dma.done.wait [#allocation4], 256  }
  0xee   :  { %248 = vsyncadd [#allocation4], 4294967040 }
  0xef   :  { %155 = vsyncpa [#allocation3], 1 }
  0xf0   :  { %156 = vsyncpa [#allocation6], 1 }
  0xf1   :  { %157 = vsyncpa [#allocation4], 1 }

</bundles_post_ra>
